<compile_context>
chip_gen: v7x
topology: tpu7x:2x2x1
jax: 0.10.0
libtpu: 0.0.40
codegen_flags: <defaults>
</compile_context>

<pallas_src>
import functools

import jax
import jax.numpy as jnp
from jax.experimental import pallas as pl
from jax.experimental.pallas import tpu as pltpu


def _label_smoothing_nce_kernel(pred_ref, tgt_ref, out_ref, *,
                                classes, smoothing, confidence):
    p = pred_ref[...].astype(jnp.float32)          # (N, C)
    t = tgt_ref[...]                               # (N, 1) int32
    n, c = p.shape

    # Numerically stable softmax along the class (lane) axis.
    m = jnp.max(p, axis=-1, keepdims=True)
    e = jnp.exp(p - m)
    denom = jnp.sum(e, axis=-1, keepdims=True)
    sm = e * pl.reciprocal(denom, approx=False)    # exact: keeps tight tolerance

    # Label-smoothed target distribution built via iota-compare instead of scatter_.
    col = jax.lax.broadcasted_iota(jnp.int32, (n, c), 1)
    smooth_val = jnp.float32(smoothing / (classes - 1))
    true_dist = jnp.where(col == t, jnp.float32(confidence), smooth_val)

    row = jnp.sum(true_dist * sm, axis=-1, keepdims=True)   # (N, 1)
    neg_log = -jnp.log(row)                                 # (N, 1)
    loss = jnp.sum(neg_log, axis=0, keepdims=True) * jnp.float32(1.0 / n)  # (1, 1)
    out_ref[...] = loss


def label_smoothing_nce_loss(pred, target, *, classes, smoothing=0.0):
    """LabelSmoothingNCELoss.forward for 2-D pred (N, C) and int targets (N,)."""
    N, C = pred.shape
    confidence = 1.0 - smoothing
    tgt2d = target.reshape(N, 1).astype(jnp.int32)

    kernel = functools.partial(
        _label_smoothing_nce_kernel,
        classes=classes, smoothing=float(smoothing), confidence=float(confidence))

    out = pl.pallas_call(
        kernel,
        out_shape=jax.ShapeDtypeStruct((1, 1), jnp.float32),
        grid=(1,),
        in_specs=[
            pl.BlockSpec((N, C), lambda i: (0, 0)),   # full-array block, VMEM resident
            pl.BlockSpec((N, 1), lambda i: (0, 0)),
        ],
        out_specs=pl.BlockSpec((1, 1), lambda i: (0, 0)),
        compiler_params=pltpu.CompilerParams(dimension_semantics=("arbitrary",)),
    )(pred, tgt2d)
    return out[0, 0]


# ---------------- pure-JAX reference (for verification) ----------------

def label_smoothing_nce_ref(pred, target, *, classes, smoothing=0.0):
    confidence = 1.0 - smoothing
    p = jax.nn.softmax(pred, axis=-1)
    true_dist = jnp.full_like(p, smoothing / (classes - 1))
    true_dist = true_dist.at[jnp.arange(p.shape[0]), target].set(confidence)
    return -jnp.mean(jnp.log(jnp.sum(true_dist * p, axis=-1)))


if __name__ == "__main__":
    # Small shapes consistent with the module: pred (batch, classes), target (batch,)
    N, C = 8, 32
    SMOOTHING = 0.1

    key = jax.random.PRNGKey(0)
    kp, kt = jax.random.split(key)
    pred = jax.random.normal(kp, (N, C), jnp.float32)
    target = jax.random.randint(kt, (N,), 0, C, jnp.int32)

    loss = label_smoothing_nce_loss(pred, target, classes=C, smoothing=SMOOTHING)
    loss = jax.block_until_ready(loss)

    ref = label_smoothing_nce_ref(pred, target, classes=C, smoothing=SMOOTHING)
    assert jnp.allclose(loss, ref, rtol=1e-4, atol=1e-5), (float(loss), float(ref))

    print("KERNEL_OK")
</pallas_src>

<mosaic_0001>
module attributes {stable_mosaic.version = 11 : i64} {
  func.func @_label_smoothing_nce_kernel(%arg0: i32, %arg1: memref<8x32xf32, #tpu.memory_space<vmem>>, %arg2: memref<8x1xi32, #tpu.memory_space<vmem>>, %arg3: memref<1x1xf32, #tpu.memory_space<vmem>>) attributes {dimension_semantics = [#tpu.dimension_semantics<arbitrary>], iteration_bounds = array<i64: 1>, scalar_prefetch = 0 : i64, scratch_operands = 0 : i64, tpu.core_type = #tpu.core_type<tc>, window_params = [{pipeline_mode = #tpu.pipeline_mode<synchronous>, transform_indices = @transform_0, window_bounds = array<i64: 8, 32>}, {pipeline_mode = #tpu.pipeline_mode<synchronous>, transform_indices = @transform_1, window_bounds = array<i64: 8, 1>}, {pipeline_mode = #tpu.pipeline_mode<synchronous>, transform_indices = @transform_2, window_bounds = array<i64: 1, 1>}]} {
    %c0 = arith.constant 0 : index
    %c0_0 = arith.constant 0 : index
    %0 = vector.load %arg1[%c0, %c0_0] : memref<8x32xf32, #tpu.memory_space<vmem>>, vector<8x32xf32>
    %c0_1 = arith.constant 0 : index
    %c0_2 = arith.constant 0 : index
    %1 = vector.load %arg2[%c0_1, %c0_2] : memref<8x1xi32, #tpu.memory_space<vmem>>, vector<8x1xi32>
    %cst = arith.constant dense<0xFF800000> : vector<8xf32>
    %2 = vector.multi_reduction <maximumf>, %0, %cst [1] : vector<8x32xf32> to vector<8xf32>
    %3 = vector.shape_cast %2 : vector<8xf32> to vector<8x1xf32>
    %4 = vector.broadcast %3 : vector<8x1xf32> to vector<8x32xf32>
    %5 = arith.subf %0, %4 : vector<8x32xf32>
    %6 = math.exp %5 : vector<8x32xf32>
    %cst_3 = arith.constant dense<0.000000e+00> : vector<8xf32>
    %7 = vector.multi_reduction <add>, %6, %cst_3 [1] : vector<8x32xf32> to vector<8xf32>
    %8 = vector.shape_cast %7 : vector<8xf32> to vector<8x1xf32>
    %9 = tpu.reciprocal %8 : vector<8x1xf32> -> vector<8x1xf32>
    %10 = vector.broadcast %9 : vector<8x1xf32> to vector<8x32xf32>
    %11 = arith.mulf %6, %10 : vector<8x32xf32>
    %12 = tpu.iota {dimensions = array<i32: 1>} : vector<8x32xi32>
    %13 = vector.broadcast %1 : vector<8x1xi32> to vector<8x32xi32>
    %14 = arith.cmpi eq, %12, %13 : vector<8x32xi32>
    %cst_4 = arith.constant 0.899999976 : f32
    %cst_5 = arith.constant 0.0032258064 : f32
    %15 = vector.broadcast %cst_4 : f32 to vector<8x32xf32>
    %16 = vector.broadcast %cst_5 : f32 to vector<8x32xf32>
    %17 = arith.select %14, %15, %16 : vector<8x32xi1>, vector<8x32xf32>
    %18 = arith.mulf %17, %11 : vector<8x32xf32>
    %cst_6 = arith.constant dense<0.000000e+00> : vector<8xf32>
    %19 = vector.multi_reduction <add>, %18, %cst_6 [1] : vector<8x32xf32> to vector<8xf32>
    %20 = vector.shape_cast %19 : vector<8xf32> to vector<8x1xf32>
    %21 = math.log %20 : vector<8x1xf32>
    %cst_7 = arith.constant 0.000000e+00 : f32
    %22 = vector.broadcast %cst_7 : f32 to vector<8x1xf32>
    %23 = arith.subf %22, %21 : vector<8x1xf32>
    %cst_8 = arith.constant dense<0.000000e+00> : vector<1xf32>
    %24 = vector.multi_reduction <add>, %23, %cst_8 [0] : vector<8x1xf32> to vector<1xf32>
    %25 = vector.shape_cast %24 : vector<1xf32> to vector<1x1xf32>
    %cst_9 = arith.constant 1.250000e-01 : f32
    %26 = vector.broadcast %cst_9 : f32 to vector<1x1xf32>
    %27 = arith.mulf %25, %26 : vector<1x1xf32>
    %c0_10 = arith.constant 0 : index
    %c0_11 = arith.constant 0 : index
    %28 = vector.load %arg3[%c0_10, %c0_11] : memref<1x1xf32, #tpu.memory_space<vmem>>, vector<1x1xf32>
    tpu.vector_store %arg3[%c0_10, %c0_11], %27 {strides = array<i32>} : memref<1x1xf32, #tpu.memory_space<vmem>>, vector<1x1xf32>,
    return
  }
  func.func @transform_0(%arg0: i32) -> (i32, i32) {
    %c0_i32 = arith.constant 0 : i32
    %c0_i32_0 = arith.constant 0 : i32
    %c0_i32_1 = arith.constant 0 : i32
    return %c0_i32, %c0_i32_0 : i32, i32
  }
  func.func @transform_1(%arg0: i32) -> (i32, i32) {
    %c0_i32 = arith.constant 0 : i32
    %c0_i32_0 = arith.constant 0 : i32
    %c0_i32_1 = arith.constant 0 : i32
    return %c0_i32, %c0_i32_0 : i32, i32
  }
  func.func @transform_2(%arg0: i32) -> (i32, i32) {
    %c0_i32 = arith.constant 0 : i32
    %c0_i32_0 = arith.constant 0 : i32
    %c0_i32_1 = arith.constant 0 : i32
    return %c0_i32, %c0_i32_0 : i32, i32
  }
}

</mosaic_0001>

<bundles_post_ra>
// kernel: tpu_custom_call.1
= control target key start
LH: loop header
LB: loop body
LE: loop exit
PB: predicated region body
PF: predicated region fallthrough
CT: control target
= control target key end

     0   :  { %vm14_vm0 = vcmask 261120   ;;  %s137_s0 = inlined_call_operand.vmem [shape: f32[8,32], index: 0, kind: input, shape index: {}]   ;;  %s138_s1 = inlined_call_operand.vmem [shape: s32[8,1], index: 1, kind: input, shape index: {}]   ;;  %s139_s2 = inlined_call_operand.hbm [shape: f32[1,1], index: 2, kind: output, shape index: {}]  }
   0x1   :  { %v12_v0 = vld [vmem:[%s137_s0] sm:$0xff] }
   0x2   :  { %7 = vsyncpa [#allocation3], 0  ;;  %v15_v1 = vsel %vm14_vm0, %v12_v0, -inf  ;;  %v13_v2 = vld [vmem:[%s138_s1] sm:$0xff]  ;;  %v98_v3 = vmov 0   ;;  %v26_v10 = vlaneseq  ;;  %s100_s0 = smov [#allocation2]  }
   0x3   :  { %16 = vmax.xlane.f32.xlu0 %v15_v1  ;;  %66 = vset.pattern.permute.xlu1 %v98_v3  ;;  %v99_v14 = vmov 0.0032258064   ;;  %s55_s1 = sshll.u32 %s100_s0, 4  ;;  %vm47_vm2 = vcmask 0   ;;  %s56_s1 = int_to_ptr.vmem [resolvable:$true] %s55_s1 }
   0x4   :  { %67 = vset.pattern.permute.xlu0 %v98_v3  ;;  %29 = vperm.xlu1 %66, %v13_v2   ;;  %v27_v11 = vand.u32 127, %v26_v10  ;;  %s74_s13 = scalar_lea.vmem %s56_s1, 16  ;;  %s78_s14 = scalar_lea.vmem %s56_s1, 32 }
   0x5   :  { %p75_p0 = scmp.ne.s32.totalorder %s56_s1, %s74_s13  ;;  %p79_p1 = scmp.lt.s32.totalorder %s56_s1, %s56_s1 }
   0x6   :  { %p80_p2 = scmp.lt.s32.totalorder %s78_s14, %s74_s13 }
   0x8   :  { %p81_p3 = por %p80_p2, %p79_p1 }
   0xa   :  { %p82_p4 = pnand %p81_p3, %p75_p0 }
  0x83   :  { %v30_v12 = vpop.permute.xlu1 %29 }
  0x84   :  { %vm31_vm1 = vcmp.eq.s32.totalorder %v27_v11, %v30_v12 }
  0x85   :  { %v32_v15 = vsel %vm31_vm1, 0.9, %v99_v14 }
  0x90   :  { %v17_v4 = vpop.xlane.xlu0 %16 }
  0x91   :  { %v18_v5 = vsub.f32 %v12_v0, %v17_v4 }
  0x93   :  { %v19_v6 = vmul.f32 1.442695, %v18_v5 }
  0x95   :  { %68 = vpow2.f32 %v19_v6 }
  0x9f   :  { %v69_v7 = vpop.eup %68 }
  0xa0   :  { %v21_v8 = vsel %vm14_vm0, %v69_v7, 0.0 }
  0xa1   :  { %22 = vadd.xlane.f32.xlu0 %v21_v8 }
 0x12e   :  { %v23_v9 = vpop.xlane.xlu0 %22 }
 0x12f   :  { %70 = vrcp.f32 %v23_v9 }
 0x139   :  { %v71_v13 = vpop.eup %70 }
 0x13a   :  { %v25_v16 = vmul.f32 %v71_v13, %v69_v7 }
 0x13c   :  { %v33_v17 = vmul.f32 %v32_v15, %v25_v16 }
 0x13e   :  { %v34_v18 = vsel %vm14_vm0, %v33_v17, 0.0 }
 0x13f   :  { %35 = vadd.xlane.f32.xlu1 %v34_v18 }
 0x1cc   :  { %v36_v19 = vpop.xlane.xlu1 %35 }
 0x1cd   :  { %72 = vlog2.f32 %v36_v19 }
 0x1d7   :  { %v73_v20 = vpop.eup %72 }
 0x1d8   :  { %v38_v21 = vmul.f32 0.6931472, %v73_v20 }
 0x1da   :  { %v39_v22 = vsub.f32 0.0, %v38_v21 }
 0x1dc   :  { %v40_v23 = vrot.slane %v39_v22, 4 }
 0x1de   :  { %v41_v24 = vadd.f32 %v40_v23, %v39_v22 }
 0x1e0   :  { %v42_v25 = vrot.slane %v41_v24, 2 }
 0x1e2   :  { %v43_v26 = vadd.f32 %v42_v25, %v41_v24 }
 0x1e4   :  { %v44_v27 = vrot.slane %v43_v26, 1 }
 0x1e6   :  { %v45_v28 = vadd.f32 %v44_v27, %v43_v26 }
 0x1e8   :  { %v46_v29 = vmul.f32 0.125, %v45_v28 }
 0x1ea   :  { %48 = vst.msk [vmem:[#allocation2] sm:$0x1] %vm47_vm2, %v46_v29 }
 0x1eb   :  { %85 = shalt.err (!%p82_p4)
}
 0x1ec   :  { %s86_s17 = scalar_lea.hbm %s139_s2, 16 }
 0x1ed   :  { %p87_p5 = scmp.ne.s32.totalorder %s139_s2, %s86_s17  ;;  %p90_p6 = scmp.lt.u32.totalorder %s86_s17, %s139_s2 }
 0x1ef   :  { %p92_p7 = pnand %p90_p6, %p87_p5 }
 0x1f1   :  { %95 = shalt.err (!%p92_p7)
}
 0x1f2   :  { %58 = dma.vmem_to_hbm [thread:$0]  %s56_s1, 16, %s139_s2, [#allocation3]  }
 0x1f3   :  { %96 = dma.done.wait [#allocation3], 16  }
 0x1f4   :  { %97 = vsyncadd [#allocation3], 4294967280 }
 0x1f5   :  { %62 = vsyncpa [#allocation3], 1 }

</bundles_post_ra>
